<compile_context>
chip_gen: v6e
topology: v6e:2x2x1
jax: 0.10.0
libtpu: 0.0.40
codegen_flags: <defaults>
</compile_context>

<pallas_src>
import functools

import jax
import jax.numpy as jnp
from jax.experimental import pallas as pl
from jax.experimental.pallas import tpu as pltpu

_LANE = 128
_SUBLANE = 8
_TB_MAX = 512  # batch tile rows; sized conservatively for v7x's 64 MiB VMEM


def _round_up(n, m):
    return ((n + m - 1) // m) * m


def _fused_mlp_kernel(x_ref, w_ref, b_ref, o_ref):
    # Single fused affine layer: [TB, K] @ [K, N] + [1, N]  (all padded /
    # lane-dense, so loads and the output store are unmasked).
    o_ref[...] = (
        jnp.dot(x_ref[...], w_ref[...], preferred_element_type=jnp.float32)
        + b_ref[...]
    ).astype(o_ref.dtype)


def fuse_and_pad_params(params):
    """Fold li1->li2->li3 (no activations) into one affine map and pad it.

    y = ((x W1 + b1) W2 + b2) W3 + b3  ==  x (W1 W2 W3) + ((b1 W2 + b2) W3 + b3)
    """
    w1, b1 = params["w1"], params["b1"]
    w2, b2 = params["w2"], params["b2"]
    w3, b3 = params["w3"], params["b3"]

    w = w1 @ w2 @ w3                       # [in_chan, out_chan]
    b = (b1 @ w2 + b2) @ w3 + b3           # [1, out_chan]

    in_chan, out_chan = int(w.shape[0]), int(w.shape[1])
    k_pad = _round_up(in_chan, _LANE)
    n_pad = _round_up(out_chan, _LANE)

    w_padded = jnp.zeros((k_pad, n_pad), jnp.float32).at[:in_chan, :out_chan].set(w)
    b_padded = jnp.zeros((1, n_pad), jnp.float32).at[:, :out_chan].set(b)
    return {"w": w_padded, "b": b_padded, "in_chan": in_chan, "out_chan": out_chan}


@functools.partial(jax.jit, static_argnames=("in_chan", "out_chan"))
def _net_forward_padded(x, w_padded, b_padded, *, in_chan, out_chan):
    batch = x.shape[0]
    k_pad, n_pad = w_padded.shape

    # Batch tile: as large as sensible, multiple of 8 sublanes.
    tb = min(_TB_MAX, _round_up(batch, _SUBLANE))
    batch_pad = _round_up(batch, tb)

    # Zero-pad x once (cheap, fused by XLA); zeros in padded K rows of W make
    # the padding mathematically inert.
    x_p = jnp.zeros((batch_pad, k_pad), jnp.float32).at[:batch, :in_chan].set(
        x.astype(jnp.float32))

    out_padded = pl.pallas_call(
        _fused_mlp_kernel,
        out_shape=jax.ShapeDtypeStruct((batch_pad, n_pad), jnp.float32),
        grid=(batch_pad // tb,),
        in_specs=[
            pl.BlockSpec((tb, k_pad), lambda i: (i, 0)),      # x: tiled over batch
            pl.BlockSpec((k_pad, n_pad), lambda i: (0, 0)),   # fused W: resident
            pl.BlockSpec((1, n_pad), lambda i: (0, 0)),       # fused b: resident
        ],
        out_specs=pl.BlockSpec((tb, n_pad), lambda i: (i, 0)),
        compiler_params=pltpu.CompilerParams(
            dimension_semantics=("parallel",)),
    )(x_p, w_padded, b_padded)

    return out_padded[:batch, :out_chan]


def net_forward(x, fused_params):
    """x: [B, in_chan] float32; fused_params: output of fuse_and_pad_params."""
    return _net_forward_padded(
        x, fused_params["w"], fused_params["b"],
        in_chan=fused_params["in_chan"], out_chan=fused_params["out_chan"])


def init_params(key, in_chan=10, out_chan=1):
    """PyTorch nn.Linear-style init, U[-1/sqrt(fan_in), +1/sqrt(fan_in)].

    Weights stored as [fan_in, fan_out] (transposed vs. PyTorch's [out, in])."""
    dims = [(in_chan, in_chan * 2), (in_chan * 2, in_chan * 4), (in_chan * 4, out_chan)]
    params = {}
    keys = jax.random.split(key, 2 * len(dims))
    for i, (fan_in, fan_out) in enumerate(dims):
        bound = 1.0 / (fan_in ** 0.5)
        params[f"w{i+1}"] = jax.random.uniform(
            keys[2 * i], (fan_in, fan_out), jnp.float32, minval=-bound, maxval=bound)
        params[f"b{i+1}"] = jax.random.uniform(
            keys[2 * i + 1], (1, fan_out), jnp.float32, minval=-bound, maxval=bound)
    return params


if __name__ == "__main__":
    key = jax.random.PRNGKey(0)
    k_param, k_x = jax.random.split(key)

    in_chan, out_chan, batch = 10, 1, 8
    params = init_params(k_param, in_chan=in_chan, out_chan=out_chan)
    fused = fuse_and_pad_params(params)

    x = jax.random.normal(k_x, (batch, in_chan), jnp.float32)

    y = net_forward(x, fused)
    y = jax.block_until_ready(y)

    # Reference: plain JAX, unfused chain (same math as the PyTorch forward).
    ref = x
    for i in (1, 2, 3):
        ref = ref @ params[f"w{i}"] + params[f"b{i}"]

    assert y.shape == (batch, out_chan)
    # Fusion reorders fp32 accumulation -> allow tiny rounding slack.
    assert jnp.allclose(y, ref, atol=1e-4, rtol=1e-4)

    print("KERNEL_OK")
</pallas_src>

<mosaic_0001>
module attributes {stable_mosaic.version = 11 : i64} {
  func.func @_fused_mlp_kernel(%arg0: i32, %arg1: memref<8x128xf32, #tpu.memory_space<vmem>>, %arg2: memref<128x128xf32, #tpu.memory_space<vmem>>, %arg3: memref<1x128xf32, #tpu.memory_space<vmem>>, %arg4: memref<8x128xf32, #tpu.memory_space<vmem>>) attributes {dimension_semantics = [#tpu.dimension_semantics<parallel>], iteration_bounds = array<i64: 1>, scalar_prefetch = 0 : i64, scratch_operands = 0 : i64, tpu.core_type = #tpu.core_type<tc>, window_params = [{transform_indices = @transform_0, window_bounds = array<i64: 8, 128>}, {pipeline_mode = #tpu.pipeline_mode<synchronous>, transform_indices = @transform_1, window_bounds = array<i64: 128, 128>}, {pipeline_mode = #tpu.pipeline_mode<synchronous>, transform_indices = @transform_2, window_bounds = array<i64: 1, 128>}, {transform_indices = @transform_3, window_bounds = array<i64: 8, 128>}]} {
    %c0 = arith.constant 0 : index
    %c0_0 = arith.constant 0 : index
    %0 = vector.load %arg1[%c0, %c0_0] : memref<8x128xf32, #tpu.memory_space<vmem>>, vector<8x128xf32>
    %c0_1 = arith.constant 0 : index
    %c0_2 = arith.constant 0 : index
    %1 = vector.load %arg2[%c0_1, %c0_2] : memref<128x128xf32, #tpu.memory_space<vmem>>, vector<128x128xf32>
    %cst = arith.constant dense<0.000000e+00> : vector<8x128xf32>
    %2 = tpu.matmul %0, %1, %cst {dimension_numbers = #tpu.dot_dimension_numbers<[1], [0], [0], [1], [0, 0, 1, 1], [], []>} : vector<8x128xf32>, vector<128x128xf32>, vector<8x128xf32> -> vector<8x128xf32>
    %c0_3 = arith.constant 0 : index
    %c0_4 = arith.constant 0 : index
    %3 = vector.load %arg3[%c0_3, %c0_4] : memref<1x128xf32, #tpu.memory_space<vmem>>, vector<1x128xf32>
    %4 = vector.broadcast %3 : vector<1x128xf32> to vector<8x128xf32>
    %5 = arith.addf %2, %4 : vector<8x128xf32>
    %c0_5 = arith.constant 0 : index
    %c0_6 = arith.constant 0 : index
    %6 = vector.load %arg4[%c0_5, %c0_6] : memref<8x128xf32, #tpu.memory_space<vmem>>, vector<8x128xf32>
    tpu.vector_store %arg4[%c0_5, %c0_6], %5 {strides = array<i32>} : memref<8x128xf32, #tpu.memory_space<vmem>>, vector<8x128xf32>,
    return
  }
  func.func @transform_0(%arg0: i32) -> (i32, i32) {
    %c0_i32 = arith.constant 0 : i32
    %c0_i32_0 = arith.constant 0 : i32
    return %arg0, %c0_i32 : i32, i32
  }
  func.func @transform_1(%arg0: i32) -> (i32, i32) {
    %c0_i32 = arith.constant 0 : i32
    %c0_i32_0 = arith.constant 0 : i32
    %c0_i32_1 = arith.constant 0 : i32
    return %c0_i32, %c0_i32_0 : i32, i32
  }
  func.func @transform_2(%arg0: i32) -> (i32, i32) {
    %c0_i32 = arith.constant 0 : i32
    %c0_i32_0 = arith.constant 0 : i32
    %c0_i32_1 = arith.constant 0 : i32
    return %c0_i32, %c0_i32_0 : i32, i32
  }
  func.func @transform_3(%arg0: i32) -> (i32, i32) {
    %c0_i32 = arith.constant 0 : i32
    %c0_i32_0 = arith.constant 0 : i32
    return %arg0, %c0_i32 : i32, i32
  }
}

</mosaic_0001>

<bundles_post_ra>
// kernel: _net_forward_padded.1
= control target key start
LH: loop header
LB: loop body
LE: loop exit
PB: predicated region body
PF: predicated region fallthrough
CT: control target
= control target key end

     0   :  { %8 = vsyncpa [#allocation3], 0  ;;  %s208_s12 = smov [#allocation2]   ;;  %s245_s0 = inlined_call_operand.vmem [shape: f32[8,128], index: 0, kind: input, shape index: {}]   ;;  %s246_s1 = inlined_call_operand.hbm [shape: f32[128,128], index: 1, kind: input, shape index: {}]   ;;  %s247_s2 = inlined_call_operand.vmem [shape: f32[1,128], index: 2, kind: input, shape index: {}]   ;;  %s248_s3 = inlined_call_operand.vmem [shape: f32[8,128], index: 3, kind: output, shape index: {}]  }
   0x1   :  { %s16_s13 = sshll.u32 %s208_s12, 4  ;;  %s17_s13 = int_to_ptr.vmem [resolvable:$true] %s16_s13 }
   0x2   :  { %s194_s14 = scalar_lea.vmem %s17_s13, 2048  ;;  %p199_p1 = scmp.lt.s32.totalorder %s17_s13, %s17_s13 }
   0x3   :  { %p195_p0 = scmp.ne.s32.totalorder %s17_s13, %s194_s14  ;;  %p200_p2 = scmp.lt.s32.totalorder %s194_s14, %s194_s14 }
   0x5   :  { %p201_p3 = por %p200_p2, %p199_p1 }
   0x7   :  { %p202_p4 = pnand %p201_p3, %p195_p0 }
   0x9   :  { %205 = shalt.err (!%p202_p4)
}
   0xa   :  { %s209_s15 = smov 128   ;;  %s210_s16 = smov 8  }
   0xb   :  { %22 = dma.hbm_to_vmem [thread:$0]  %s246_s1, 2048, %s17_s13, [#allocation3], %s209_s15, %s209_s15, %s210_s16  }
   0xc   :  { %206 = dma.done.wait [#allocation3], 2048  }
   0xd   :  { %207 = vsyncadd [#allocation3], 4294965248  ;;  %v211_v0 = vmov 0.0   ;;  %vm212_vm0 = vmmov 0   ;;  %v44_v1 = vld [vmem:[#allocation2 + $0x78] sm:$0xff]  ;;  %v43_v2 = vld [vmem:[#allocation2 + $0x70] sm:$0xff] }
   0xe   :  { %146 = vmatprep.subr.mxu0 %v211_v0  ;;  %178 = vmatprep.mubr.msk.f32.mxu0 %vm212_vm0, %v211_v0  ;;  %v42_v3 = vld [vmem:[#allocation2 + $0x68] sm:$0xff]  ;;  %v41_v4 = vld [vmem:[#allocation2 + $0x60] sm:$0xff]  ;;  %v40_v5 = vld [vmem:[#allocation2 + $0x58] sm:$0xff] }
   0xf   :  { %147 = vmatpush3.msra.mxu0 %v44_v1  ;;  %v39_v6 = vld [vmem:[#allocation2 + $0x50] sm:$0xff]  ;;  %v38_v7 = vld [vmem:[#allocation2 + $0x48] sm:$0xff]  ;;  %v37_v8 = vld [vmem:[#allocation2 + $0x40] sm:$0xff] }
  0x10   :  { %148 = vmatprep.subr.mxu0 %v211_v0  ;;  %v36_v9 = vld [vmem:[#allocation2 + $0x38] sm:$0xff]  ;;  %v35_v10 = vld [vmem:[#allocation2 + $0x30] sm:$0xff]  ;;  %v34_v11 = vld [vmem:[#allocation2 + $0x28] sm:$0xff] }
  0x11   :  { %149 = vmatpush3.msra.mxu0 %v43_v2  ;;  %v33_v12 = vld [vmem:[#allocation2 + $0x20] sm:$0xff]  ;;  %v32_v13 = vld [vmem:[#allocation2 + $0x18] sm:$0xff]  ;;  %v31_v14 = vld [vmem:[#allocation2 + $0x10] sm:$0xff] }
  0x12   :  { %150 = vmatprep.subr.mxu0 %v211_v0  ;;  %v30_v15 = vld [vmem:[#allocation2 + $0x8] sm:$0xff]  ;;  %v29_v16 = vld [vmem:[#allocation2] sm:$0xff] }
  0x13   :  { %151 = vmatpush3.msra.mxu0 %v42_v3  ;;  %v28_v17 = vld [vmem:[%s245_s0] sm:$0xff] }
  0x14   :  { %152 = vmatprep.subr.mxu0 %v211_v0  ;;  %v128_v18 = vld [vmem:[%s247_s2] ss:$0 sm:$0xff] }
  0x15   :  { %153 = vmatpush3.msra.mxu0 %v41_v4 }
  0x16   :  { %154 = vmatprep.subr.mxu0 %v211_v0 }
  0x17   :  { %155 = vmatpush3.msra.mxu0 %v40_v5 }
  0x18   :  { %156 = vmatprep.subr.mxu0 %v211_v0 }
  0x19   :  { %157 = vmatpush3.msra.mxu0 %v39_v6 }
  0x1a   :  { %158 = vmatprep.subr.mxu0 %v211_v0 }
  0x1b   :  { %159 = vmatpush3.msra.mxu0 %v38_v7 }
  0x1c   :  { %160 = vmatprep.subr.mxu0 %v211_v0 }
  0x1d   :  { %161 = vmatpush3.msra.mxu0 %v37_v8 }
  0x1e   :  { %162 = vmatprep.subr.mxu0 %v211_v0 }
  0x1f   :  { %163 = vmatpush3.msra.mxu0 %v36_v9 }
  0x20   :  { %164 = vmatprep.subr.mxu0 %v211_v0 }
  0x21   :  { %165 = vmatpush3.msra.mxu0 %v35_v10 }
  0x22   :  { %166 = vmatprep.subr.mxu0 %v211_v0 }
  0x23   :  { %167 = vmatpush3.msra.mxu0 %v34_v11 }
  0x24   :  { %168 = vmatprep.subr.mxu0 %v211_v0 }
  0x25   :  { %169 = vmatpush3.msra.mxu0 %v33_v12 }
  0x26   :  { %170 = vmatprep.subr.mxu0 %v211_v0 }
  0x27   :  { %171 = vmatpush3.msra.mxu0 %v32_v13 }
  0x28   :  { %172 = vmatprep.subr.mxu0 %v211_v0 }
  0x29   :  { %173 = vmatpush3.msra.mxu0 %v31_v14 }
  0x2a   :  { %174 = vmatprep.subr.mxu0 %v211_v0 }
  0x2b   :  { %175 = vmatpush3.msra.mxu0 %v30_v15 }
  0x2c   :  { %176 = vmatprep.subr.mxu0 %v211_v0 }
  0x2d   :  { %177 = vmatpush3.msra.mxu0 %v29_v16 }
  0x2e   :  { %179 = vmatmul.mubr.f32.vlgmr.msra.gmra.mxu0 %v28_v17 }
  0xee   :  { %v118_v19 = vpop.f32.mrf.mxu0 }
  0xef   :  { %v119_v20 = vadd.f32 %v128_v18, %v118_v19 }
  0xf0   :  { %v180_v21 = vpop.f32.mrf.mxu0 }
  0xf1   :  { %122 = vst [vmem:[%s248_s3] sm:$0xff] %v119_v20 }
  0xf2   :  { %127 = vsyncpa [#allocation3], 1 }

</bundles_post_ra>
